<compile_context>
chip_gen: v7x
topology: tpu7x:2x2x1
jax: 0.10.0
libtpu: 0.0.40
codegen_flags: <defaults>
</compile_context>

<pallas_src>
import functools

import jax
import jax.numpy as jnp
import numpy as np
from jax import lax
from jax.experimental import pallas as pl
from jax.experimental.pallas import tpu as pltpu

EPS = 1e-5


def bottleneck_kernel(xT_ref, w1T_ref, g1_ref, b1_ref,
                      w2T_ref, g2_ref, b2_ref,
                      w3T_ref, g3_ref, b3_ref,
                      mask_ref, oT_ref, *, H, W):
    Cin, M = xT_ref.shape
    inv_m = 1.0 / M

    xT = xT_ref[...]                                   # (Cin, M), lane-dense

    def bn(hT, g_ref, b_ref, relu):
        # hT: (C, M).  Single sweep: sum & sum-of-squares, then one FMA/elem.
        s = jnp.sum(hT, axis=1, keepdims=True)
        ss = jnp.sum(hT * hT, axis=1, keepdims=True)
        mean = s * inv_m
        var = ss * inv_m - mean * mean                 # biased variance
        scale = g_ref[...] * lax.rsqrt(var + EPS)      # (C, 1)  (EUP rsqrt)
        shift = b_ref[...] - mean * scale              # (C, 1)
        y = hT * scale + shift
        return jnp.maximum(y, 0.0) if relu else y

    # --- conv1 (1x1) + bn1 + relu -------------------------------------------
    h1 = jnp.dot(w1T_ref[...], xT, preferred_element_type=jnp.float32)  # (Cmid, M)
    h1 = bn(h1, g1_ref, b1_ref, relu=True)

    # --- conv2 (3x3, stride=1, pad=1) as a single im2col matmul --------------
    # Spatial shift (dh, dw) == lane-roll of the flattened (n, h, w) axis by
    # -(dh*W + dw); positions that fall outside the image are zeroed with the
    # precomputed static 0/1 mask (one vmul per non-center tap).
    taps = []
    for kh in range(3):
        for kw in range(3):
            dh, dw = kh - 1, kw - 1
            t = kh * 3 + kw
            if dh == 0 and dw == 0:
                taps.append(h1)
                continue
            shifted = pltpu.roll(h1, shift=(-(dh * W + dw)) % M, axis=1)
            taps.append(shifted * mask_ref[t:t + 1, :])
    patches = jnp.concatenate(taps, axis=0)            # (9*Cmid, M)
    h2 = jnp.dot(w2T_ref[...], patches, preferred_element_type=jnp.float32)
    h2 = bn(h2, g2_ref, b2_ref, relu=True)

    # --- conv3 (1x1) + bn3 + residual + relu ----------------------------------
    h3 = jnp.dot(w3T_ref[...], h2, preferred_element_type=jnp.float32)  # (Cout, M)
    h3 = bn(h3, g3_ref, b3_ref, relu=False)
    oT_ref[...] = jnp.maximum(h3 + xT, 0.0)            # Cin == Cout (no downsample)


def _tap_masks(N, H, W):
    """Static 0/1 validity masks, one row per 3x3 tap, over the flat M axis."""
    M = N * H * W
    lane = np.arange(M)
    wi = lane % W
    hi = (lane // W) % H
    masks = np.ones((9, M), np.float32)
    for kh in range(3):
        for kw in range(3):
            dh, dw = kh - 1, kw - 1
            if dh == 0 and dw == 0:
                continue
            valid = ((hi + dh >= 0) & (hi + dh < H) &
                     (wi + dw >= 0) & (wi + dw < W))
            masks[kh * 3 + kw] = valid.astype(np.float32)
    return jnp.asarray(masks)


def basic_block_forward(x_nchw, params):
    """x_nchw: (N, Cin, H, W) float32 -> (N, Cout, H, W) float32."""
    w1T, g1, b1, w2T, g2, b2, w3T, g3, b3 = params
    N, Cin, H, W = x_nchw.shape
    Cout = w3T.shape[0]
    M = N * H * W

    # Lane-dense transposed slab: channels on sublanes, M = N*H*W on lanes.
    # (all reshapes/transposes stay in the XLA wrapper)
    xT = jnp.transpose(x_nchw, (1, 0, 2, 3)).reshape(Cin, M).astype(jnp.float32)
    masks = _tap_masks(N, H, W)                       # static constant slab

    kernel = functools.partial(bottleneck_kernel, H=H, W=W)
    oT = pl.pallas_call(
        kernel,
        out_shape=jax.ShapeDtypeStruct((Cout, M), jnp.float32),
        in_specs=[pl.BlockSpec(memory_space=pltpu.MemorySpace.VMEM)] * 11,
        out_specs=pl.BlockSpec(memory_space=pltpu.MemorySpace.VMEM),
        compiler_params=pltpu.CompilerParams(
            vmem_limit_bytes=32 * 1024 * 1024),   # explicit; safe on v5e/v6e/v7x
    )(xT, w1T, g1, b1, w2T, g2, b2, w3T, g3, b3, masks)

    return jnp.transpose(oT.reshape(Cout, N, H, W), (1, 0, 2, 3))


def reference_forward(x_nchw, params):
    """Pure-JAX reference (same training-mode BN semantics) for validation."""
    w1T, g1, b1, w2T, g2, b2, w3T, g3, b3 = params
    Cmid = w1T.shape[0]

    def bn(h, gamma, beta):  # h: NHWC; gamma/beta: (C, 1)
        mean = jnp.mean(h, axis=(0, 1, 2), keepdims=True)
        var = jnp.mean((h - mean) ** 2, axis=(0, 1, 2), keepdims=True)
        return (h - mean) * lax.rsqrt(var + EPS) * gamma[:, 0] + beta[:, 0]

    x = jnp.transpose(x_nchw, (0, 2, 3, 1)).astype(jnp.float32)      # NHWC
    h = jnp.einsum('nhwc,dc->nhwd', x, w1T)
    h = jax.nn.relu(bn(h, g1, b1))
    # w2T[o, (kh*3+kw)*Cmid + i] == W[o, i, kh, kw]  ->  HWIO
    w2_hwio = jnp.transpose(w2T.reshape(Cmid, 3, 3, Cmid), (1, 2, 3, 0))
    h = lax.conv_general_dilated(h, w2_hwio, (1, 1), 'SAME',
                                 dimension_numbers=('NHWC', 'HWIO', 'NHWC'))
    h = jax.nn.relu(bn(h, g2, b2))
    h = jnp.einsum('nhwc,dc->nhwd', h, w3T)
    h = bn(h, g3, b3)
    y = jax.nn.relu(h + x)
    return jnp.transpose(y, (0, 3, 1, 2))


if __name__ == "__main__":
    key = jax.random.PRNGKey(0)
    N, Cin, H, W = 2, 32, 8, 8          # chess-board-like 8x8 spatial, M = 128
    Cmid = 8                             # intermediate_channels
    Cout = Cmid * 4                      # expansion = 4 (== Cin, no downsample)

    ks = jax.random.split(key, 10)
    x = jax.random.normal(ks[0], (N, Cin, H, W), jnp.float32)
    # Parameters in the kernel's transposed layout.
    w1T = 0.1 * jax.random.normal(ks[1], (Cmid, Cin), jnp.float32)        # (Cout, Cin) of conv1
    g1 = 1.0 + 0.1 * jax.random.normal(ks[2], (Cmid, 1), jnp.float32)
    b1 = 0.1 * jax.random.normal(ks[3], (Cmid, 1), jnp.float32)
    w2T = 0.1 * jax.random.normal(ks[4], (Cmid, 9 * Cmid), jnp.float32)   # [o, (kh*3+kw)*Cin+i]
    g2 = 1.0 + 0.1 * jax.random.normal(ks[5], (Cmid, 1), jnp.float32)
    b2 = 0.1 * jax.random.normal(ks[6], (Cmid, 1), jnp.float32)
    w3T = 0.1 * jax.random.normal(ks[7], (Cout, Cmid), jnp.float32)       # (Cout, Cin) of conv3
    g3 = 1.0 + 0.1 * jax.random.normal(ks[8], (Cout, 1), jnp.float32)
    b3 = 0.1 * jax.random.normal(ks[9], (Cout, 1), jnp.float32)
    params = (w1T, g1, b1, w2T, g2, b2, w3T, g3, b3)

    out = jax.block_until_ready(basic_block_forward(x, params))
    ref = jax.block_until_ready(reference_forward(x, params))

    assert out.shape == (N, Cout, H, W)
    np.testing.assert_allclose(np.asarray(out), np.asarray(ref), rtol=2e-3, atol=2e-3)
    print("KERNEL_OK")
</pallas_src>

<mosaic_0001>
module attributes {stable_mosaic.version = 11 : i64} {
  func.func @bottleneck_kernel(%arg0: memref<32x128xf32, #tpu.memory_space<vmem>>, %arg1: memref<8x32xf32, #tpu.memory_space<vmem>>, %arg2: memref<8x1xf32, #tpu.memory_space<vmem>>, %arg3: memref<8x1xf32, #tpu.memory_space<vmem>>, %arg4: memref<8x72xf32, #tpu.memory_space<vmem>>, %arg5: memref<8x1xf32, #tpu.memory_space<vmem>>, %arg6: memref<8x1xf32, #tpu.memory_space<vmem>>, %arg7: memref<32x8xf32, #tpu.memory_space<vmem>>, %arg8: memref<32x1xf32, #tpu.memory_space<vmem>>, %arg9: memref<32x1xf32, #tpu.memory_space<vmem>>, %arg10: memref<9x128xf32, #tpu.memory_space<vmem>>, %arg11: memref<32x128xf32, #tpu.memory_space<vmem>>) attributes {dimension_semantics = [], scalar_prefetch = 0 : i64, scratch_operands = 0 : i64, tpu.core_type = #tpu.core_type<tc>} {
    %c0 = arith.constant 0 : index
    %c0_0 = arith.constant 0 : index
    %0 = vector.load %arg0[%c0, %c0_0] : memref<32x128xf32, #tpu.memory_space<vmem>>, vector<32x128xf32>
    %c0_1 = arith.constant 0 : index
    %c0_2 = arith.constant 0 : index
    %1 = vector.load %arg1[%c0_1, %c0_2] : memref<8x32xf32, #tpu.memory_space<vmem>>, vector<8x32xf32>
    %cst = arith.constant dense<0.000000e+00> : vector<8x128xf32>
    %2 = tpu.matmul %1, %0, %cst {dimension_numbers = #tpu.dot_dimension_numbers<[1], [0], [0], [1], [0, 0, 1, 1], [], []>} : vector<8x32xf32>, vector<32x128xf32>, vector<8x128xf32> -> vector<8x128xf32>
    %cst_3 = arith.constant dense<0.000000e+00> : vector<8xf32>
    %3 = vector.multi_reduction <add>, %2, %cst_3 [1] : vector<8x128xf32> to vector<8xf32>
    %4 = vector.shape_cast %3 : vector<8xf32> to vector<8x1xf32>
    %5 = arith.mulf %2, %2 : vector<8x128xf32>
    %cst_4 = arith.constant dense<0.000000e+00> : vector<8xf32>
    %6 = vector.multi_reduction <add>, %5, %cst_4 [1] : vector<8x128xf32> to vector<8xf32>
    %7 = vector.shape_cast %6 : vector<8xf32> to vector<8x1xf32>
    %cst_5 = arith.constant 7.812500e-03 : f32
    %8 = vector.broadcast %cst_5 : f32 to vector<8x1xf32>
    %9 = arith.mulf %4, %8 : vector<8x1xf32>
    %cst_6 = arith.constant 7.812500e-03 : f32
    %10 = vector.broadcast %cst_6 : f32 to vector<8x1xf32>
    %11 = arith.mulf %7, %10 : vector<8x1xf32>
    %12 = arith.mulf %9, %9 : vector<8x1xf32>
    %13 = arith.subf %11, %12 : vector<8x1xf32>
    %c0_7 = arith.constant 0 : index
    %c0_8 = arith.constant 0 : index
    %14 = vector.load %arg2[%c0_7, %c0_8] : memref<8x1xf32, #tpu.memory_space<vmem>>, vector<8x1xf32>
    %cst_9 = arith.constant 9.99999974E-6 : f32
    %15 = vector.broadcast %cst_9 : f32 to vector<8x1xf32>
    %16 = arith.addf %13, %15 : vector<8x1xf32>
    %17 = math.rsqrt %16 : vector<8x1xf32>
    %18 = arith.mulf %14, %17 : vector<8x1xf32>
    %c0_10 = arith.constant 0 : index
    %c0_11 = arith.constant 0 : index
    %19 = vector.load %arg3[%c0_10, %c0_11] : memref<8x1xf32, #tpu.memory_space<vmem>>, vector<8x1xf32>
    %20 = arith.mulf %9, %18 : vector<8x1xf32>
    %21 = arith.subf %19, %20 : vector<8x1xf32>
    %22 = vector.broadcast %18 : vector<8x1xf32> to vector<8x128xf32>
    %23 = arith.mulf %2, %22 : vector<8x128xf32>
    %24 = vector.broadcast %21 : vector<8x1xf32> to vector<8x128xf32>
    %25 = arith.addf %23, %24 : vector<8x128xf32>
    %cst_12 = arith.constant 0.000000e+00 : f32
    %26 = vector.broadcast %cst_12 : f32 to vector<8x128xf32>
    %27 = arith.maximumf %25, %26 : vector<8x128xf32>
    %c9_i32 = arith.constant 9 : i32
    %28 = tpu.dynamic_rotate %27 by %c9_i32 dim 1 : vector<8x128xf32>, i32 -> vector<8x128xf32>
    %c0_13 = arith.constant 0 : index
    %c0_14 = arith.constant 0 : index
    %29 = vector.load %arg10[%c0_13, %c0_14] : memref<9x128xf32, #tpu.memory_space<vmem>>, vector<1x128xf32>
    %30 = vector.broadcast %29 : vector<1x128xf32> to vector<8x128xf32>
    %31 = arith.mulf %28, %30 : vector<8x128xf32>
    %c8_i32 = arith.constant 8 : i32
    %32 = tpu.dynamic_rotate %27 by %c8_i32 dim 1 : vector<8x128xf32>, i32 -> vector<8x128xf32>
    %c1 = arith.constant 1 : index
    %c0_15 = arith.constant 0 : index
    %33 = vector.load %arg10[%c1, %c0_15] : memref<9x128xf32, #tpu.memory_space<vmem>>, vector<1x128xf32>
    %34 = vector.broadcast %33 : vector<1x128xf32> to vector<8x128xf32>
    %35 = arith.mulf %32, %34 : vector<8x128xf32>
    %c7_i32 = arith.constant 7 : i32
    %36 = tpu.dynamic_rotate %27 by %c7_i32 dim 1 : vector<8x128xf32>, i32 -> vector<8x128xf32>
    %c2 = arith.constant 2 : index
    %c0_16 = arith.constant 0 : index
    %37 = vector.load %arg10[%c2, %c0_16] : memref<9x128xf32, #tpu.memory_space<vmem>>, vector<1x128xf32>
    %38 = vector.broadcast %37 : vector<1x128xf32> to vector<8x128xf32>
    %39 = arith.mulf %36, %38 : vector<8x128xf32>
    %c1_i32 = arith.constant 1 : i32
    %40 = tpu.dynamic_rotate %27 by %c1_i32 dim 1 : vector<8x128xf32>, i32 -> vector<8x128xf32>
    %c3 = arith.constant 3 : index
    %c0_17 = arith.constant 0 : index
    %41 = vector.load %arg10[%c3, %c0_17] : memref<9x128xf32, #tpu.memory_space<vmem>>, vector<1x128xf32>
    %42 = vector.broadcast %41 : vector<1x128xf32> to vector<8x128xf32>
    %43 = arith.mulf %40, %42 : vector<8x128xf32>
    %c127_i32 = arith.constant 127 : i32
    %44 = tpu.dynamic_rotate %27 by %c127_i32 dim 1 : vector<8x128xf32>, i32 -> vector<8x128xf32>
    %c5 = arith.constant 5 : index
    %c0_18 = arith.constant 0 : index
    %45 = vector.load %arg10[%c5, %c0_18] : memref<9x128xf32, #tpu.memory_space<vmem>>, vector<1x128xf32>
    %46 = vector.broadcast %45 : vector<1x128xf32> to vector<8x128xf32>
    %47 = arith.mulf %44, %46 : vector<8x128xf32>
    %c121_i32 = arith.constant 121 : i32
    %48 = tpu.dynamic_rotate %27 by %c121_i32 dim 1 : vector<8x128xf32>, i32 -> vector<8x128xf32>
    %c6 = arith.constant 6 : index
    %c0_19 = arith.constant 0 : index
    %49 = vector.load %arg10[%c6, %c0_19] : memref<9x128xf32, #tpu.memory_space<vmem>>, vector<1x128xf32>
    %50 = vector.broadcast %49 : vector<1x128xf32> to vector<8x128xf32>
    %51 = arith.mulf %48, %50 : vector<8x128xf32>
    %c120_i32 = arith.constant 120 : i32
    %52 = tpu.dynamic_rotate %27 by %c120_i32 dim 1 : vector<8x128xf32>, i32 -> vector<8x128xf32>
    %c7 = arith.constant 7 : index
    %c0_20 = arith.constant 0 : index
    %53 = vector.load %arg10[%c7, %c0_20] : memref<9x128xf32, #tpu.memory_space<vmem>>, vector<1x128xf32>
    %54 = vector.broadcast %53 : vector<1x128xf32> to vector<8x128xf32>
    %55 = arith.mulf %52, %54 : vector<8x128xf32>
    %c119_i32 = arith.constant 119 : i32
    %56 = tpu.dynamic_rotate %27 by %c119_i32 dim 1 : vector<8x128xf32>, i32 -> vector<8x128xf32>
    %c8 = arith.constant 8 : index
    %c0_21 = arith.constant 0 : index
    %57 = vector.load %arg10[%c8, %c0_21] : memref<9x128xf32, #tpu.memory_space<vmem>>, vector<1x128xf32>
    %58 = vector.broadcast %57 : vector<1x128xf32> to vector<8x128xf32>
    %59 = arith.mulf %56, %58 : vector<8x128xf32>
    %60 = tpu.concatenate %31, %35, %39, %43, %27, %47, %51, %55, %59 in 0 : vector<8x128xf32>, vector<8x128xf32>, vector<8x128xf32>, vector<8x128xf32>, vector<8x128xf32>, vector<8x128xf32>, vector<8x128xf32>, vector<8x128xf32>, vector<8x128xf32> -> vector<72x128xf32>
    %c0_22 = arith.constant 0 : index
    %c0_23 = arith.constant 0 : index
    %61 = vector.load %arg4[%c0_22, %c0_23] : memref<8x72xf32, #tpu.memory_space<vmem>>, vector<8x72xf32>
    %cst_24 = arith.constant dense<0.000000e+00> : vector<8x128xf32>
    %62 = tpu.matmul %61, %60, %cst_24 {dimension_numbers = #tpu.dot_dimension_numbers<[1], [0], [0], [1], [0, 0, 1, 1], [], []>} : vector<8x72xf32>, vector<72x128xf32>, vector<8x128xf32> -> vector<8x128xf32>
    %cst_25 = arith.constant dense<0.000000e+00> : vector<8xf32>
    %63 = vector.multi_reduction <add>, %62, %cst_25 [1] : vector<8x128xf32> to vector<8xf32>
    %64 = vector.shape_cast %63 : vector<8xf32> to vector<8x1xf32>
    %65 = arith.mulf %62, %62 : vector<8x128xf32>
    %cst_26 = arith.constant dense<0.000000e+00> : vector<8xf32>
    %66 = vector.multi_reduction <add>, %65, %cst_26 [1] : vector<8x128xf32> to vector<8xf32>
    %67 = vector.shape_cast %66 : vector<8xf32> to vector<8x1xf32>
    %cst_27 = arith.constant 7.812500e-03 : f32
    %68 = vector.broadcast %cst_27 : f32 to vector<8x1xf32>
    %69 = arith.mulf %64, %68 : vector<8x1xf32>
    %cst_28 = arith.constant 7.812500e-03 : f32
    %70 = vector.broadcast %cst_28 : f32 to vector<8x1xf32>
    %71 = arith.mulf %67, %70 : vector<8x1xf32>
    %72 = arith.mulf %69, %69 : vector<8x1xf32>
    %73 = arith.subf %71, %72 : vector<8x1xf32>
    %c0_29 = arith.constant 0 : index
    %c0_30 = arith.constant 0 : index
    %74 = vector.load %arg5[%c0_29, %c0_30] : memref<8x1xf32, #tpu.memory_space<vmem>>, vector<8x1xf32>
    %cst_31 = arith.constant 9.99999974E-6 : f32
    %75 = vector.broadcast %cst_31 : f32 to vector<8x1xf32>
    %76 = arith.addf %73, %75 : vector<8x1xf32>
    %77 = math.rsqrt %76 : vector<8x1xf32>
    %78 = arith.mulf %74, %77 : vector<8x1xf32>
    %c0_32 = arith.constant 0 : index
    %c0_33 = arith.constant 0 : index
    %79 = vector.load %arg6[%c0_32, %c0_33] : memref<8x1xf32, #tpu.memory_space<vmem>>, vector<8x1xf32>
    %80 = arith.mulf %69, %78 : vector<8x1xf32>
    %81 = arith.subf %79, %80 : vector<8x1xf32>
    %82 = vector.broadcast %78 : vector<8x1xf32> to vector<8x128xf32>
    %83 = arith.mulf %62, %82 : vector<8x128xf32>
    %84 = vector.broadcast %81 : vector<8x1xf32> to vector<8x128xf32>
    %85 = arith.addf %83, %84 : vector<8x128xf32>
    %cst_34 = arith.constant 0.000000e+00 : f32
    %86 = vector.broadcast %cst_34 : f32 to vector<8x128xf32>
    %87 = arith.maximumf %85, %86 : vector<8x128xf32>
    %c0_35 = arith.constant 0 : index
    %c0_36 = arith.constant 0 : index
    %88 = vector.load %arg7[%c0_35, %c0_36] : memref<32x8xf32, #tpu.memory_space<vmem>>, vector<32x8xf32>
    %cst_37 = arith.constant dense<0.000000e+00> : vector<32x128xf32>
    %89 = tpu.matmul %88, %87, %cst_37 {dimension_numbers = #tpu.dot_dimension_numbers<[1], [0], [0], [1], [0, 0, 1, 1], [], []>} : vector<32x8xf32>, vector<8x128xf32>, vector<32x128xf32> -> vector<32x128xf32>
    %cst_38 = arith.constant dense<0.000000e+00> : vector<32xf32>
    %90 = vector.multi_reduction <add>, %89, %cst_38 [1] : vector<32x128xf32> to vector<32xf32>
    %91 = vector.shape_cast %90 : vector<32xf32> to vector<32x1xf32>
    %92 = arith.mulf %89, %89 : vector<32x128xf32>
    %cst_39 = arith.constant dense<0.000000e+00> : vector<32xf32>
    %93 = vector.multi_reduction <add>, %92, %cst_39 [1] : vector<32x128xf32> to vector<32xf32>
    %94 = vector.shape_cast %93 : vector<32xf32> to vector<32x1xf32>
    %cst_40 = arith.constant 7.812500e-03 : f32
    %95 = vector.broadcast %cst_40 : f32 to vector<32x1xf32>
    %96 = arith.mulf %91, %95 : vector<32x1xf32>
    %cst_41 = arith.constant 7.812500e-03 : f32
    %97 = vector.broadcast %cst_41 : f32 to vector<32x1xf32>
    %98 = arith.mulf %94, %97 : vector<32x1xf32>
    %99 = arith.mulf %96, %96 : vector<32x1xf32>
    %100 = arith.subf %98, %99 : vector<32x1xf32>
    %c0_42 = arith.constant 0 : index
    %c0_43 = arith.constant 0 : index
    %101 = vector.load %arg8[%c0_42, %c0_43] : memref<32x1xf32, #tpu.memory_space<vmem>>, vector<32x1xf32>
    %cst_44 = arith.constant 9.99999974E-6 : f32
    %102 = vector.broadcast %cst_44 : f32 to vector<32x1xf32>
    %103 = arith.addf %100, %102 : vector<32x1xf32>
    %104 = math.rsqrt %103 : vector<32x1xf32>
    %105 = arith.mulf %101, %104 : vector<32x1xf32>
    %c0_45 = arith.constant 0 : index
    %c0_46 = arith.constant 0 : index
    %106 = vector.load %arg9[%c0_45, %c0_46] : memref<32x1xf32, #tpu.memory_space<vmem>>, vector<32x1xf32>
    %107 = arith.mulf %96, %105 : vector<32x1xf32>
    %108 = arith.subf %106, %107 : vector<32x1xf32>
    %109 = vector.broadcast %105 : vector<32x1xf32> to vector<32x128xf32>
    %110 = arith.mulf %89, %109 : vector<32x128xf32>
    %111 = vector.broadcast %108 : vector<32x1xf32> to vector<32x128xf32>
    %112 = arith.addf %110, %111 : vector<32x128xf32>
    %113 = arith.addf %112, %0 : vector<32x128xf32>
    %cst_47 = arith.constant 0.000000e+00 : f32
    %114 = vector.broadcast %cst_47 : f32 to vector<32x128xf32>
    %115 = arith.maximumf %113, %114 : vector<32x128xf32>
    %c0_48 = arith.constant 0 : index
    %c0_49 = arith.constant 0 : index
    %116 = vector.load %arg11[%c0_48, %c0_49] : memref<32x128xf32, #tpu.memory_space<vmem>>, vector<32x128xf32>
    tpu.vector_store %arg11[%c0_48, %c0_49], %115 {strides = array<i32>} : memref<32x128xf32, #tpu.memory_space<vmem>>, vector<32x128xf32>,
    return
  }
}

</mosaic_0001>

<bundles_post_ra>
// kernel: tpu_custom_call.1
= control target key start
LH: loop header
LB: loop body
LE: loop exit
PB: predicated region body
PF: predicated region fallthrough
CT: control target
= control target key end

     0   :  { %v701_v3 = vmov 0.0|0.0   ;;  %vm702_vm0 = vmmov 0   ;;  %v703_v6 = vmov 0.0   ;;  %s928_s0 = inlined_call_operand.vmem [shape: f32[32,128], index: 0, kind: input, shape index: {}]   ;;  %s929_s1 = inlined_call_operand.vmem [shape: f32[8,32], index: 1, kind: input, shape index: {}]   ;;  %s930_s2 = inlined_call_operand.vmem [shape: f32[8,1], index: 2, kind: input, shape index: {}]   ;;  %s931_s3 = inlined_call_operand.vmem [shape: f32[8,1], index: 3, kind: input, shape index: {}]   ;;  %s932_s4 = inlined_call_operand.vmem [shape: f32[8,72], index: 4, kind: input, shape index: {}]   ;;  %s933_s5 = inlined_call_operand.vmem [shape: f32[8,1], index: 5, kind: input, shape index: {}]   ;;  %s934_s6 = inlined_call_operand.vmem [shape: f32[8,1], index: 6, kind: input, shape index: {}]   ;;  %s935_s7 = inlined_call_operand.vmem [shape: f32[32,8], index: 7, kind: input, shape index: {}]   ;;  %s936_s8 = inlined_call_operand.vmem [shape: f32[32,1], index: 8, kind: input, shape index: {}]   ;;  %s937_s9 = inlined_call_operand.vmem [shape: f32[32,1], index: 9, kind: input, shape index: {}]   ;;  %s938_s10 = inlined_call_operand.vmem [shape: f32[9,128], index: 10, kind: input, shape index: {}]   ;;  %s939_s11 = inlined_call_operand.hbm [shape: f32[32,128], index: 11, kind: output, shape index: {}]  }
   0x1   :  { %v778_v0 = vld [vmem:[%s928_s0] sm:$0xff]  ;;  %v783_v1 = vld [vmem:[%s928_s0 + $0x8] sm:$0xff]  ;;  %v788_v2 = vld [vmem:[%s928_s0 + $0x10] sm:$0xff]  ;;  %631 = vmatprep.subr.bf16.mxu0 %v701_v3  ;;  %599 = vmatprep.mubr.msk.f32.mxu0 %vm702_vm0, %v703_v6 }
   0x2   :  { %v632_v4 = vpack.c.bf16 %v783_v1, %v778_v0  ;;  %v796_v5 = vld [vmem:[%s928_s0 + $0x18] sm:$0xff] }
   0x3   :  { %16 = vsyncpa [#allocation3], 0  ;;  %637 = vmatprep.subr.bf16.mxu1 %v701_v3  ;;  %620 = vmatprep.mubr.msk.f32.mxu1 %vm702_vm0, %v703_v6  ;;  %v635_v7 = vpack.c.bf16 %v796_v5, %v788_v2  ;;  %v43_v8 = vld [vmem:[%s929_s1] sm:$0xff]  ;;  %vm44_vm1 = vcmask 261120   ;;  %v704_v12 = vmov 0   ;;  %s705_s29 = smov 8  }
   0x4   :  { %633 = vmatpush3.bf16.msra.mxu0 %v632_v4  ;;  %663 = vset.pattern.permute.xlu1 %v704_v12  ;;  %v127_v20 = vld [vmem:[%s930_s2] sm:$0xff]  ;;  %s706_s30 = smov 9   ;;  %s707_s2 = smov 7   ;;  %v565_v56 = vld [vmem:[%s938_s10 + $0x8] ss:$0 sm:$0xff]  ;;  %vm212_vm2 = vcmask 588800  }
   0x5   :  { %634 = vmatprep.subr.bf16.mxu0 %v701_v3  ;;  %664 = vset.pattern.permute.xlu0 %v704_v12  ;;  %v131_v23 = vld [vmem:[%s931_s3] sm:$0xff]  ;;  %s708_s12 = smov 119   ;;  %s709_s13 = smov 1   ;;  %vm319_vm3 = vcmask 64512  }
   0x6   :  { %s710_s3 = smov 127   ;;  %s711_s14 = smov 121   ;;  %v559_v31 = vld [vmem:[%s938_s10 + $0x1] ss:$0 sm:$0xff]  ;;  %v558_v32 = vld [vmem:[%s938_s10] ss:$0 sm:$0xff] }
   0x7   :  { %s712_s15 = smov 120   ;;  %v560_v39 = vld [vmem:[%s938_s10 + $0x2] ss:$0 sm:$0xff]  ;;  %v561_v40 = vld [vmem:[%s938_s10 + $0x3] ss:$0 sm:$0xff] }
   0x8   :  { %636 = vmatpush3.bf16.msra.mxu0 %v635_v7  ;;  %v562_v44 = vld [vmem:[%s938_s10 + $0x5] ss:$0 sm:$0xff]  ;;  %v563_v50 = vld [vmem:[%s938_s10 + $0x6] ss:$0 sm:$0xff]  ;;  %v564_v51 = vld [vmem:[%s938_s10 + $0x7] ss:$0 sm:$0xff] }
   0x9   :  { %v211_v59 = vld [vmem:[%s932_s4] sm:$0xff] }
   0xb   :  { %600 = vmatmul.mubr.msk.f32.vlgmr.msra.gmra.mrb[0].mxu0 %vm44_vm1, %v43_v8 }
  0xde   :  { %v114_v9 = vpop.f32.mrb[0].mxu0 }
  0xdf   :  { %118 = vadd.xlane.f32.xlu0 %v114_v9  ;;  %v601_v10 = vpop.f32.mrb[1].mxu0  ;;  %v120_v11 = vmul.f32 %v114_v9, %v114_v9 }
  0xe0   :  { %v295_v10 = vld [vmem:[%s933_s5] sm:$0xff] }
  0xe3   :  { %121 = vadd.xlane.f32.xlu0 %v120_v11 }
 0x16c   :  { %v119_v13 = vpop.xlane.xlu0 %118 }
 0x16d   :  { %v123_v14 = vmul.f32 0.0078125, %v119_v13  ;;  %v299_v13 = vld [vmem:[%s934_s6] sm:$0xff] }
 0x16f   :  { %v125_v16 = vmul.f32 %v123_v14, %v123_v14 }
 0x170   :  { %v122_v15 = vpop.xlane.xlu0 %121 }
 0x171   :  { %v124_v17 = vmul.f32 0.0078125, %v122_v15 }
 0x173   :  { %v126_v18 = vsub.f32 %v124_v17, %v125_v16  ;;  %v315_v16 = vld [vmem:[%s935_s7] sm:$0xff] }
 0x174   :  { %625 = vmatprep.mubr.msk.f32.mxu0 %vm319_vm3, %v315_v16 }
 0x175   :  { %v128_v19 = vadd.f32 1e-05, %v126_v18 }
 0x177   :  { %665 = vrsqrt.f32 %v128_v19 }
 0x181   :  { %v666_v21 = vpop.eup %665 }
 0x182   :  { %v130_v22 = vmul.f32 %v666_v21, %v127_v20 }
 0x184   :  { %136 = vperm.xlu1 %663, %v130_v22   ;;  %v132_v24 = vmul.f32 %v130_v22, %v123_v14  ;;  %v316_v22 = vld [vmem:[%s935_s7 + $0x8] sm:$0xff] }
 0x186   :  { %v133_v25 = vsub.f32 %v131_v23, %v132_v24  ;;  %v317_v23 = vld [vmem:[%s935_s7 + $0x10] sm:$0xff]  ;;  %v318_v24 = vld [vmem:[%s935_s7 + $0x18] sm:$0xff] }
 0x188   :  { %142 = vperm.xlu1 %663, %v133_v25  }
 0x203   :  { %v137_v26 = vpop.permute.xlu1 %136 }
 0x204   :  { %v139_v27 = vmul.f32 %v137_v26, %v114_v9 }
 0x207   :  { %v143_v28 = vpop.permute.xlu1 %142 }
 0x208   :  { %v145_v29 = vadd.f32 %v143_v28, %v139_v27 }
 0x20a   :  { %v146_v30 = vmax.f32 %v145_v29, 0.0 }
 0x20c   :  { %155 = vrot.lane.b32.xlu1 %v146_v30, %s705_s29  ;;  %147 = vrot.lane.b32.xlu0 %v146_v30, %s706_s30 }
 0x210   :  { %163 = vrot.lane.b32.xlu1 %v146_v30, %s707_s2  ;;  %203 = vrot.lane.b32.xlu0 %v146_v30, %s708_s12 }
 0x214   :  { %171 = vrot.lane.b32.xlu1 %v146_v30, %s709_s13 }
 0x218   :  { %179 = vrot.lane.b32.xlu1 %v146_v30, %s710_s3 }
 0x21c   :  { %187 = vrot.lane.b32.xlu1 %v146_v30, %s711_s14 }
 0x220   :  { %195 = vrot.lane.b32.xlu1 %v146_v30, %s712_s15 }
 0x27e   :  { %v156_v33 = vpop.permute.xlu1 %155  ;;  %v148_v34 = vpop.permute.xlu0 %147 }
 0x27f   :  { %v162_v35 = vmul.f32 %v559_v31, %v156_v33  ;;  %v154_v36 = vmul.f32 %v558_v32, %v148_v34 }
 0x281   :  { %v638_v37 = vpack.c.bf16 %v162_v35, %v154_v36 }
 0x282   :  { %v164_v38 = vpop.permute.xlu1 %163  ;;  %v204_v57 = vpop.permute.xlu0 %203 }
 0x283   :  { %639 = vmatpush3.bf16.msra.mxu1 %v638_v37  ;;  %v170_v42 = vmul.f32 %v560_v39, %v164_v38  ;;  %v210_v58 = vmul.f32 %v565_v56, %v204_v57  ;;  %v454_v56 = vld [vmem:[%s936_s8 + $0x8] sm:$0xff] }
 0x284   :  { %640 = vmatprep.subr.bf16.mxu1 %v701_v3 }
 0x286   :  { %v172_v41 = vpop.permute.xlu1 %171 }
 0x287   :  { %v178_v43 = vmul.f32 %v561_v40, %v172_v41 }
 0x289   :  { %v641_v45 = vpack.c.bf16 %v178_v43, %v170_v42 }
 0x28a   :  { %v180_v46 = vpop.permute.xlu1 %179 }
 0x28b   :  { %v186_v47 = vmul.f32 %v562_v44, %v180_v46  ;;  %642 = vmatpush3.bf16.msra.mxu1 %v641_v45 }
 0x28c   :  { %643 = vmatprep.subr.bf16.mxu1 %v701_v3 }
 0x28d   :  { %v644_v48 = vpack.c.bf16 %v186_v47, %v146_v30 }
 0x28e   :  { %v188_v49 = vpop.permute.xlu1 %187 }
 0x28f   :  { %645 = vmatpush3.bf16.msra.mxu1 %v644_v48  ;;  %v194_v53 = vmul.f32 %v563_v50, %v188_v49 }
 0x290   :  { %646 = vmatprep.subr.bf16.mxu1 %v701_v3 }
 0x292   :  { %v196_v52 = vpop.permute.xlu1 %195 }
 0x293   :  { %v202_v54 = vmul.f32 %v564_v51, %v196_v52 }
 0x295   :  { %v647_v55 = vpack.c.bf16 %v202_v54, %v194_v53 }
 0x297   :  { %648 = vmatpush3.bf16.msra.mxu1 %v647_v55 }
 0x298   :  { %618 = vmatprep.subr.mxu1 %v703_v6 }
 0x29b   :  { %619 = vmatpush3.msra.mxu1 %v210_v58 }
 0x29c   :  { %621 = vmatmul.mubr.msk.f32.vlgmr.msra.gmra.mrb[0].mxu1 %vm212_vm2, %v211_v59 }
 0x36f   :  { %v282_v60 = vpop.f32.mrb[0].mxu1 }
 0x370   :  { %286 = vadd.xlane.f32.xlu1 %v282_v60  ;;  %v622_v61 = vpop.f32.mrb[1].mxu1  ;;  %v288_v62 = vmul.f32 %v282_v60, %v282_v60 }
 0x372   :  { %289 = vadd.xlane.f32.xlu0 %v288_v62 }
 0x3fd   :  { %v287_v63 = vpop.xlane.xlu1 %286 }
 0x3fe   :  { %v291_v3 = vmul.f32 0.0078125, %v287_v63  ;;  %v453_v63 = vld [vmem:[%s936_s8] sm:$0xff] }
 0x3ff   :  { %v290_v4 = vpop.xlane.xlu0 %289 }
 0x400   :  { %v293_v7 = vmul.f32 %v291_v3, %v291_v3  ;;  %v292_v8 = vmul.f32 0.0078125, %v290_v4 }
 0x402   :  { %v294_v9 = vsub.f32 %v292_v8, %v293_v7  ;;  %v469_v8 = vld [vmem:[%s937_s9] sm:$0xff] }
 0x404   :  { %v296_v6 = vadd.f32 1e-05, %v294_v9 }
 0x406   :  { %667 = vrsqrt.f32 %v296_v6  ;;  %v456_v6 = vld [vmem:[%s936_s8 + $0x18] sm:$0xff] }
 0x410   :  { %v668_v11 = vpop.eup %667 }
 0x411   :  { %v298_v12 = vmul.f32 %v668_v11, %v295_v10 }
 0x413   :  { %304 = vperm.xlu0 %664, %v298_v12   ;;  %v300_v14 = vmul.f32 %v298_v12, %v291_v3 }
 0x415   :  { %v301_v15 = vsub.f32 %v299_v13, %v300_v14  ;;  %v470_v14 = vld [vmem:[%s937_s9 + $0x8] sm:$0xff] }
 0x417   :  { %310 = vperm.xlu1 %663, %v301_v15   ;;  %v455_v15 = vld [vmem:[%s936_s8 + $0x10] sm:$0xff]  ;;  %s713_s8 = smov [#allocation2]  }
 0x492   :  { %v305_v17 = vpop.permute.xlu0 %304 }
 0x493   :  { %v307_v18 = vmul.f32 %v305_v17, %v282_v60 }
 0x496   :  { %v311_v19 = vpop.permute.xlu1 %310 }
 0x497   :  { %v313_v20 = vadd.f32 %v311_v19, %v307_v18  ;;  %v471_v19 = vld [vmem:[%s937_s9 + $0x10] sm:$0xff] }
 0x499   :  { %v314_v21 = vmax.f32 %v313_v20, 0.0 }
 0x49b   :  { %623 = vmatprep.subr.mxu0 %v314_v21 }
 0x49c   :  { %624 = vmatpush3.msra.mxu0 %v314_v21 }
 0x49d   :  { %626 = vmatmul.mubr.msk.f32.vlgmr.msra.gmra.mrb[2].mxu0 %vm319_vm3, %v316_v22  ;;  %v472_v22 = vld [vmem:[%s937_s9 + $0x18] sm:$0xff]  ;;  %s546_s9 = sshll.u32 %s713_s8, 4  ;;  %s547_s9 = int_to_ptr.vmem [resolvable:$true] %s546_s9 }
 0x49e   :  { %628 = vmatprep.mubr.msk.f32.mxu0 %vm319_vm3, %v317_v23  ;;  %s677_s13 = scalar_lea.vmem %s547_s9, 512  ;;  %p682_p1 = scmp.lt.s32.totalorder %s547_s9, %s547_s9 }
 0x49f   :  { %p678_p0 = scmp.ne.s32.totalorder %s547_s9, %s677_s13  ;;  %p683_p2 = scmp.lt.s32.totalorder %s677_s13, %s677_s13 }
 0x4a1   :  { %629 = vmatmul.mubr.msk.f32.gmra.mrb[4].mxu0 %vm319_vm3, %v318_v24  ;;  %p684_p3 = por %p683_p2, %p682_p1 }
 0x4a3   :  { %p685_p4 = pnand %p684_p3, %p678_p0 }
 0x570   :  { %v863_v25 = vpop.f32.mrb[2].mxu0 }
 0x571   :  { %v865_v26 = vpop.f32.mrb[3].mxu0  ;;  %419 = vadd.xlane.f32.xlu0 %v863_v25  ;;  %v426_v27 = vmul.f32 %v863_v25, %v863_v25 }
 0x572   :  { %417 = vadd.xlane.f32.xlu1 %v865_v26  ;;  %v425_v31 = vmul.f32 %v865_v26, %v865_v26 }
 0x574   :  { %v871_v28 = vpop.f32.mrb[4].mxu0 }
 0x575   :  { %v428_v29 = vmul.f32 %v871_v28, %v871_v28  ;;  %v875_v30 = vpop.f32.mrb[5].mxu0 }
 0x576   :  { %431 = vadd.xlane.f32.xlu1 %v426_v27  ;;  %v427_v32 = vmul.f32 %v875_v30, %v875_v30 }
 0x577   :  { %435 = vadd.xlane.f32.xlu0 %v428_v29 }
 0x57a   :  { %429 = vadd.xlane.f32.xlu1 %v425_v31 }
 0x57e   :  { %423 = vadd.xlane.f32.xlu1 %v871_v28 }
 0x582   :  { %421 = vadd.xlane.f32.xlu1 %v875_v30 }
 0x586   :  { %433 = vadd.xlane.f32.xlu1 %v427_v32 }
 0x5fe   :  { %v420_v33 = vpop.xlane.xlu0 %419 }
 0x5ff   :  { %v418_v34 = vpop.xlane.xlu1 %417  ;;  %v438_v35 = vmul.f32 0.0078125, %v420_v33 }
 0x600   :  { %v437_v37 = vmul.f32 0.0078125, %v418_v34 }
 0x601   :  { %v446_v38 = vmul.f32 %v438_v35, %v438_v35 }
 0x602   :  { %v445_v42 = vmul.f32 %v437_v37, %v437_v37 }
 0x603   :  { %v432_v36 = vpop.xlane.xlu1 %431 }
 0x604   :  { %v442_v39 = vmul.f32 0.0078125, %v432_v36  ;;  %v436_v45 = vpop.xlane.xlu0 %435 }
 0x605   :  { %v444_v50 = vmul.f32 0.0078125, %v436_v45 }
 0x606   :  { %v450_v40 = vsub.f32 %v442_v39, %v446_v38 }
 0x607   :  { %v430_v41 = vpop.xlane.xlu1 %429 }
 0x608   :  { %v458_v43 = vadd.f32 1e-05, %v450_v40  ;;  %v441_v44 = vmul.f32 0.0078125, %v430_v41 }
 0x60a   :  { %669 = vrsqrt.f32 %v458_v43  ;;  %v449_v46 = vsub.f32 %v441_v44, %v445_v42 }
 0x60b   :  { %v424_v47 = vpop.xlane.xlu1 %423 }
 0x60c   :  { %v457_v48 = vadd.f32 1e-05, %v449_v46  ;;  %v440_v49 = vmul.f32 0.0078125, %v424_v47 }
 0x60e   :  { %671 = vrsqrt.f32 %v457_v48  ;;  %v448_v51 = vmul.f32 %v440_v49, %v440_v49 }
 0x60f   :  { %v422_v52 = vpop.xlane.xlu1 %421 }
 0x610   :  { %v452_v53 = vsub.f32 %v444_v50, %v448_v51  ;;  %v439_v54 = vmul.f32 0.0078125, %v422_v52 }
 0x612   :  { %v460_v55 = vadd.f32 1e-05, %v452_v53  ;;  %v447_v59 = vmul.f32 %v439_v54, %v439_v54 }
 0x613   :  { %v434_v57 = vpop.xlane.xlu1 %433 }
 0x614   :  { %v670_v58 = vpop.eup %669  ;;  %673 = vrsqrt.f32 %v460_v55  ;;  %v443_v60 = vmul.f32 0.0078125, %v434_v57 }
 0x615   :  { %v466_v61 = vmul.f32 %v670_v58, %v454_v56 }
 0x616   :  { %v451_v62 = vsub.f32 %v443_v60, %v447_v59 }
 0x617   :  { %488 = vperm.xlu0 %664, %v466_v61   ;;  %v474_v13 = vmul.f32 %v466_v61, %v438_v35 }
 0x618   :  { %v672_v3 = vpop.eup %671  ;;  %v459_v4 = vadd.f32 1e-05, %v451_v62 }
 0x619   :  { %v465_v7 = vmul.f32 %v672_v3, %v453_v63  ;;  %v478_v16 = vsub.f32 %v470_v14, %v474_v13 }
 0x61a   :  { %675 = vrsqrt.f32 %v459_v4 }
 0x61b   :  { %483 = vperm.xlu1 %663, %v465_v7   ;;  %v473_v9 = vmul.f32 %v465_v7, %v437_v37 }
 0x61d   :  { %v477_v10 = vsub.f32 %v469_v8, %v473_v9 }
 0x61e   :  { %v674_v11 = vpop.eup %673 }
 0x61f   :  { %507 = vperm.xlu0 %664, %v477_v10   ;;  %v468_v12 = vmul.f32 %v674_v11, %v456_v6 }
 0x621   :  { %498 = vperm.xlu1 %663, %v468_v12   ;;  %v476_v21 = vmul.f32 %v468_v12, %v440_v49 }
 0x623   :  { %v480_v24 = vsub.f32 %v472_v22, %v476_v21 }
 0x624   :  { %v676_v17 = vpop.eup %675 }
 0x625   :  { %512 = vperm.xlu1 %663, %v478_v16   ;;  %v467_v18 = vmul.f32 %v676_v17, %v455_v15 }
 0x627   :  { %v475_v20 = vmul.f32 %v467_v18, %v439_v54 }
 0x629   :  { %493 = vperm.xlu1 %663, %v467_v18   ;;  %v479_v23 = vsub.f32 %v471_v19, %v475_v20 }
 0x62b   :  { %517 = vperm.xlu0 %664, %v479_v23  }
 0x62d   :  { %522 = vperm.xlu1 %663, %v480_v24  }
 0x696   :  { %v489_v27 = vpop.permute.xlu0 %488 }
 0x697   :  { %v502_v36 = vmul.f32 %v863_v25, %v489_v27 }
 0x69a   :  { %v484_v29 = vpop.permute.xlu1 %483 }
 0x69b   :  { %v501_v31 = vmul.f32 %v484_v29, %v865_v26 }
 0x69e   :  { %v508_v32 = vpop.permute.xlu0 %507 }
 0x69f   :  { %v525_v33 = vadd.f32 %v508_v32, %v501_v31 }
 0x6a0   :  { %v499_v34 = vpop.permute.xlu1 %498 }
 0x6a1   :  { %v529_v35 = vadd.f32 %v525_v33, %v778_v0  ;;  %v504_v26 = vmul.f32 %v871_v28, %v499_v34 }
 0x6a3   :  { %v533_v37 = vmax.f32 %v529_v35, 0.0 }
 0x6a4   :  { %v513_v38 = vpop.permute.xlu1 %512 }
 0x6a5   :  { %537 = vst [vmem:[#allocation2] sm:$0xff] %v533_v37  ;;  %v526_v39 = vadd.f32 %v513_v38, %v502_v36 }
 0x6a7   :  { %v530_v40 = vadd.f32 %v526_v39, %v783_v1 }
 0x6a8   :  { %v494_v41 = vpop.permute.xlu1 %493 }
 0x6a9   :  { %v534_v42 = vmax.f32 %v530_v40, 0.0  ;;  %v503_v43 = vmul.f32 %v494_v41, %v875_v30 }
 0x6aa   :  { %v518_v44 = vpop.permute.xlu0 %517 }
 0x6ab   :  { %538 = vst [vmem:[#allocation2 + $0x8] sm:$0xff] %v534_v42  ;;  %v527_v45 = vadd.f32 %v518_v44, %v503_v43 }
 0x6ac   :  { %v523_v46 = vpop.permute.xlu1 %522 }
 0x6ad   :  { %v531_v0 = vadd.f32 %v527_v45, %v788_v2  ;;  %v528_v47 = vadd.f32 %v523_v46, %v504_v26 }
 0x6af   :  { %v535_v25 = vmax.f32 %v531_v0, 0.0  ;;  %v532_v48 = vadd.f32 %v528_v47, %v796_v5 }
 0x6b1   :  { %539 = vst [vmem:[#allocation2 + $0x10] sm:$0xff] %v535_v25  ;;  %v536_v1 = vmax.f32 %v532_v48, 0.0 }
 0x6b3   :  { %540 = vst [vmem:[#allocation2 + $0x18] sm:$0xff] %v536_v1 }
 0x6b4   :  { %688 = shalt.err (!%p685_p4)
}
 0x6b5   :  { %s689_s14 = scalar_lea.hbm %s939_s11, 512 }
 0x6b6   :  { %p690_p5 = scmp.ne.s32.totalorder %s939_s11, %s689_s14  ;;  %p693_p6 = scmp.lt.u32.totalorder %s689_s14, %s939_s11 }
 0x6b8   :  { %p695_p7 = pnand %p693_p6, %p690_p5 }
 0x6ba   :  { %698 = shalt.err (!%p695_p7)
}
 0x6bb   :  { %s714_s17 = smov 128  }
 0x6bc   :  { %552 = dma.vmem_to_hbm [thread:$0]  %s547_s9, 512, %s939_s11, [#allocation3], %s714_s17, %s714_s17, %s705_s29  }
 0x6bd   :  { %699 = dma.done.wait [#allocation3], 512  }
 0x6be   :  { %700 = vsyncadd [#allocation3], 4294966784 }
 0x6bf   :  { %556 = vsyncpa [#allocation3], 1 }

</bundles_post_ra>
